<compile_context>
chip_gen: v7x
topology: tpu7x:2x2x1
jax: 0.10.0
libtpu: 0.0.40
codegen_flags: <defaults>
</compile_context>

<pallas_src>
import functools
import numpy as np
import jax
import jax.numpy as jnp
from jax import lax
from jax.experimental import pallas as pl
from jax.experimental.pallas import tpu as pltpu

N_JOINTS = 55
LANES = 128          # joints padded to a full lane width -> unmasked vector ops/stores
OUT_ROWS = 16        # 9 rotation-matrix rows + 7 zero-padding rows (2 full f32 vregs)
N_EXP = 10           # model_cfg.n_exp (small, synthetic)
N_FRAMES = 4         # number of frames in the synthetic "dataset"

DEFAULT_FIX_IDX = tuple(list(range(1, 12)) + [13, 14, 18, 19, 20, 21] + list(range(25, 55)))


# ----------------------------------------------------------------------------------
# rotation_converter pieces used at __init__ time (plain-JAX glue, not the hot path)
# ----------------------------------------------------------------------------------
def euler_to_quaternion(r):
    x = r[..., 0] * 0.5
    y = r[..., 1] * 0.5
    z = r[..., 2] * 0.5
    cz, sz = jnp.cos(z), jnp.sin(z)
    cy, sy = jnp.cos(y), jnp.sin(y)
    cx, sx = jnp.cos(x), jnp.sin(x)
    qw = cx * cy * cz - sx * sy * sz
    qx = cx * sy * sz + cy * cz * sx
    qy = cx * cz * sy - sx * cy * sz
    qz = cx * cy * sz + sx * cz * sy
    return jnp.stack([qw, qx, qy, qz], axis=-1)


def quaternion_to_angle_axis(q):
    q1, q2, q3 = q[..., 1], q[..., 2], q[..., 3]
    sin_sq = q1 * q1 + q2 * q2 + q3 * q3
    sin_t = jnp.sqrt(sin_sq)
    cos_t = q[..., 0]
    two_theta = 2.0 * jnp.where(cos_t < 0.0,
                                jnp.arctan2(-sin_t, -cos_t),
                                jnp.arctan2(sin_t, cos_t))
    safe_sin = jnp.where(sin_sq > 0.0, sin_t, 1.0)
    k = jnp.where(sin_sq > 0.0, two_theta / safe_sin, 2.0)
    return jnp.stack([q1 * k, q2 * k, q3 * k], axis=-1)


def batch_euler2axis(r):
    return quaternion_to_angle_axis(euler_to_quaternion(r))


# ----------------------------------------------------------------------------------
# Plain-JAX reference of batch_axis2matrix (for correctness checking only)
# ----------------------------------------------------------------------------------
def batch_axis2matrix_ref(aa):
    a0, a1, a2 = aa[:, 0:1], aa[:, 1:2], aa[:, 2:3]
    theta_sq = a0 * a0 + a1 * a1 + a2 * a2
    theta = jnp.sqrt(theta_sq)
    half = 0.5 * theta
    mask = theta_sq > 0.0
    theta_safe = jnp.where(mask, theta, 1.0)
    k = jnp.where(mask, jnp.sin(half) / theta_safe, 0.5)
    w = jnp.where(mask, jnp.cos(half), 1.0)
    x, y, z = a0 * k, a1 * k, a2 * k
    n = jnp.sqrt(w * w + x * x + y * y + z * z)
    w, x, y, z = w / n, x / n, y / n, z / n
    w2, x2, y2, z2 = w * w, x * x, y * y, z * z
    wx, wy, wz = w * x, w * y, w * z
    xy, xz, yz = x * y, x * z, y * z
    rot = jnp.concatenate([
        w2 + x2 - y2 - z2, 2 * xy - 2 * wz,     2 * wy + 2 * xz,
        2 * wz + 2 * xy,   w2 - x2 + y2 - z2,   2 * yz - 2 * wx,
        2 * xz - 2 * wy,   2 * wx + 2 * yz,     w2 - x2 - y2 + z2,
    ], axis=-1)
    return rot.reshape(-1, 3, 3)


# ----------------------------------------------------------------------------------
# Pallas kernel: select(fix) on axis-angle input + axis-angle -> rotation matrix.
# Inputs : mask (1,128) f32 (1.0 = joint is fixed, take init), pose slab (3,128),
#          init slab (3,128).  Output: (16,128) slab, rows 0..8 = flattened 3x3.
# ----------------------------------------------------------------------------------
def _axis2mat_kernel(mask_ref, pose_ref, init_ref, out_ref):
    fixed = mask_ref[...] > 0.5                                   # (1, LANES) bool
    aa = jnp.where(fixed, init_ref[...], pose_ref[...])          # (3, LANES) packed select

    sq = aa * aa                                                  # packed square
    theta_sq = sq[0:1, :] + sq[1:2, :] + sq[2:3, :]               # (1, LANES)
    theta = jnp.sqrt(theta_sq)
    half = 0.5 * theta
    nz = theta_sq > 0.0
    theta_safe = jnp.where(nz, theta, 1.0)
    k = jnp.where(nz, jnp.sin(half) / theta_safe, 0.5)            # exact div (accuracy)
    w = jnp.where(nz, jnp.cos(half), 1.0)

    xyz = aa * k                                                  # packed (3, LANES)
    x = xyz[0:1, :]
    y = xyz[1:2, :]
    z = xyz[2:3, :]
    inv_n = lax.rsqrt(w * w + x * x + y * y + z * z)              # quaternion normalize
    w, x, y, z = w * inv_n, x * inv_n, y * inv_n, z * inv_n
    w2, x2, y2, z2 = w * w, x * x, y * y, z * z
    wx, wy, wz = w * x, w * y, w * z
    xy, xz, yz = x * y, x * z, y * z
    rows = [w2 + x2 - y2 - z2, 2 * xy - 2 * wz,     2 * wy + 2 * xz,
            2 * wz + 2 * xy,   w2 - x2 + y2 - z2,   2 * yz - 2 * wx,
            2 * xz - 2 * wy,   2 * wx + 2 * yz,     w2 - x2 - y2 + z2]

    # Single coalesced store: 9 data rows + 7 zero-pad rows -> two unmasked vreg stores.
    pad = jnp.zeros((OUT_ROWS - 9, LANES), jnp.float32)
    out_ref[...] = jnp.concatenate(rows + [pad], axis=0)


_axis2mat_call = pl.pallas_call(
    _axis2mat_kernel,
    out_shape=jax.ShapeDtypeStruct((OUT_ROWS, LANES), jnp.float32),
    in_specs=[pl.BlockSpec(memory_space=pltpu.MemorySpace.VMEM)] * 3,
    out_specs=pl.BlockSpec(memory_space=pltpu.MemorySpace.VMEM),
)


# ----------------------------------------------------------------------------------
# Jitted wrappers (single dispatch per forward; one compiled kernel for all fix sets)
# ----------------------------------------------------------------------------------
@jax.jit
def _forward_core(pose_slab, init_slab, mask, lights, frame_idx):
    out = _axis2mat_call(mask, pose_slab, init_slab)              # (16, LANES)
    slab = out[:9]                                                # lane-dense (9, LANES)
    # De-slab to the torch (1,55,3,3) layout ONCE, inside the same jitted dispatch.
    full_pose = slab[:, :N_JOINTS].T.reshape(1, N_JOINTS, 3, 3)
    light = lights[frame_idx].reshape(frame_idx.shape[0], 9, 3)
    return slab, full_pose, light


@jax.jit
def _init_pose_matrices(init_slab):
    ones = jnp.ones((1, LANES), jnp.float32)                      # all joints "fixed"
    out = _axis2mat_call(ones, init_slab, init_slab)
    slab = out[:9]
    return slab, slab[:, :N_JOINTS].T.reshape(1, N_JOINTS, 3, 3)


@functools.lru_cache(maxsize=None)
def _fix_mask_cached(fix_tuple):
    """Tiny (1,128) f32 mask built on host once per fix-set; data operand, no recompile."""
    m = np.zeros((1, LANES), np.float32)
    for j in fix_tuple:
        if 0 <= int(j) < N_JOINTS:
            m[0, int(j)] = 1.0
    return jnp.asarray(m)


# ----------------------------------------------------------------------------------
# PoseModel equivalent (parameter setup + forward)
# ----------------------------------------------------------------------------------
def build_params():
    # __init__ of PoseModel (deterministic)
    init_euler = np.full((N_JOINTS, 3), 1e-5, dtype=np.float32)
    init_euler[0, 0] = np.pi
    init_euler[16, 2] = -np.pi * 60 / 180
    init_euler[17, 2] = np.pi * 60 / 180
    init_aa = batch_euler2axis(jnp.asarray(init_euler))           # (55, 3) axis-angle

    # In the torch module `pose` starts equal to init_full_pose; add a small deterministic
    # perturbation so the fix_idx selection is observable in the test.
    key = jax.random.PRNGKey(0)
    pose_aa = init_aa + 0.05 * jax.random.normal(key, (N_JOINTS, 3), jnp.float32)

    # Parameters kept PERMANENTLY in the (3,128) slab layout the kernel consumes.
    pose_slab = jnp.zeros((3, LANES), jnp.float32).at[:, :N_JOINTS].set(pose_aa.T)
    init_slab = jnp.zeros((3, LANES), jnp.float32).at[:, :N_JOINTS].set(init_aa.T)

    # Frozen init-pose rotation matrices: computed ONCE here, reused every forward.
    init_slab9, init_full_pose_mat = _init_pose_matrices(init_slab)

    exp = jnp.zeros((1, N_EXP), jnp.float32)
    lights = jnp.zeros((N_FRAMES, 1, 9, 3), jnp.float32)          # per-frame light params
    return dict(pose_slab=pose_slab, init_slab=init_slab,
                init_full_pose_slab=init_slab9, init_full_pose_mat=init_full_pose_mat,
                exp=exp, lights=lights)


def pose_model_forward(params, batch, extra_fix_idx=None):
    frame_ids = batch['frame_id']
    batch_size = len(frame_ids)
    # The torch module reshapes 55*9 elements into (batch_size, 55, 3, 3), which only
    # works for batch_size == 1.
    # TODO(synk): if batching is ever allowed, stack poses on the sublane axis
    # ((3*B,128) in / (9*B,128) out) to amortize the fixed per-call overhead.
    assert batch_size == 1

    fix_idx = set(DEFAULT_FIX_IDX)
    if extra_fix_idx is not None:
        fix_idx |= {int(i) for i in extra_fix_idx}
    mask = _fix_mask_cached(tuple(sorted(fix_idx)))               # operand, never recompiles

    frame_idx = jnp.asarray([int(f[1:]) for f in frame_ids], dtype=jnp.int32)
    slab, full_pose, light = _forward_core(params['pose_slab'], params['init_slab'],
                                           mask, params['lights'], frame_idx)

    batch['full_pose'] = full_pose                                # (1, 55, 3, 3) torch layout
    batch['full_pose_slab'] = slab                                # (9, 128) lane-dense form
    batch['init_full_pose'] = params['init_full_pose_mat']        # frozen, precomputed once
    batch['init_full_pose_slab'] = params['init_full_pose_slab']
    batch['exp'] = params['exp']                                  # (1, n_exp) passthrough
    batch['light'] = light                                        # (1, 9, 3)
    return batch


if __name__ == "__main__":
    params = build_params()

    batch = {'frame_id': ['f0003']}                               # batch_size = 1
    batch = pose_model_forward(params, batch)
    jax.block_until_ready(batch['full_pose'])

    # Correctness check vs. plain-JAX reference of the torch semantics
    pose_aa = params['pose_slab'][:, :N_JOINTS].T                 # (55, 3)
    init_aa = params['init_slab'][:, :N_JOINTS].T                 # (55, 3)
    ref_pose_mat = batch_axis2matrix_ref(pose_aa)                 # (55, 3, 3)
    ref_init_mat = batch_axis2matrix_ref(init_aa)                 # (55, 3, 3)

    fix_idx = np.array(DEFAULT_FIX_IDX)
    ref_full = ref_pose_mat.at[fix_idx].set(ref_init_mat[fix_idx])[None]
    np.testing.assert_allclose(np.asarray(batch['full_pose']), np.asarray(ref_full),
                               rtol=1e-5, atol=1e-5)
    np.testing.assert_allclose(np.asarray(batch['init_full_pose']), np.asarray(ref_init_mat[None]),
                               rtol=1e-5, atol=1e-5)
    assert batch['exp'].shape == (1, N_EXP)
    assert batch['light'].shape == (1, 9, 3)

    # extra_fix_idx path: same compiled kernel (mask is just data), new selection result
    batch2 = pose_model_forward(params, {'frame_id': ['f0001']}, extra_fix_idx=[12, 15])
    jax.block_until_ready(batch2['full_pose'])
    fix_idx2 = np.array(sorted(set(DEFAULT_FIX_IDX) | {12, 15}))
    ref_full2 = ref_pose_mat.at[fix_idx2].set(ref_init_mat[fix_idx2])[None]
    np.testing.assert_allclose(np.asarray(batch2['full_pose']), np.asarray(ref_full2),
                               rtol=1e-5, atol=1e-5)
    assert batch2['light'].shape == (1, 9, 3)

    print("KERNEL_OK")
</pallas_src>

<mosaic_0001>
module attributes {stable_mosaic.version = 11 : i64} {
  func.func @_axis2mat_kernel(%arg0: memref<1x128xf32, #tpu.memory_space<vmem>>, %arg1: memref<3x128xf32, #tpu.memory_space<vmem>>, %arg2: memref<3x128xf32, #tpu.memory_space<vmem>>, %arg3: memref<16x128xf32, #tpu.memory_space<vmem>>) attributes {dimension_semantics = [], scalar_prefetch = 0 : i64, scratch_operands = 0 : i64, tpu.core_type = #tpu.core_type<tc>} {
    %c0 = arith.constant 0 : index
    %c0_0 = arith.constant 0 : index
    %0 = vector.load %arg0[%c0, %c0_0] : memref<1x128xf32, #tpu.memory_space<vmem>>, vector<1x128xf32>
    %cst = arith.constant 5.000000e-01 : f32
    %1 = vector.broadcast %cst : f32 to vector<1x128xf32>
    %2 = arith.cmpf ogt, %0, %1 : vector<1x128xf32>
    %c0_1 = arith.constant 0 : index
    %c0_2 = arith.constant 0 : index
    %3 = vector.load %arg2[%c0_1, %c0_2] : memref<3x128xf32, #tpu.memory_space<vmem>>, vector<3x128xf32>
    %c0_3 = arith.constant 0 : index
    %c0_4 = arith.constant 0 : index
    %4 = vector.load %arg1[%c0_3, %c0_4] : memref<3x128xf32, #tpu.memory_space<vmem>>, vector<3x128xf32>
    %5 = vector.shape_cast %2 : vector<1x128xi1> to vector<1x128xi1>
    %6 = vector.broadcast %5 : vector<1x128xi1> to vector<3x128xi1>
    %7 = arith.select %6, %3, %4 : vector<3x128xi1>, vector<3x128xf32>
    %8 = arith.mulf %7, %7 : vector<3x128xf32>
    %9 = vector.extract_strided_slice %8 {offsets = [0, 0], sizes = [1, 128], strides = [1, 1]} : vector<3x128xf32> to vector<1x128xf32>
    %10 = vector.extract_strided_slice %8 {offsets = [1, 0], sizes = [1, 128], strides = [1, 1]} : vector<3x128xf32> to vector<1x128xf32>
    %11 = arith.addf %9, %10 : vector<1x128xf32>
    %12 = vector.extract_strided_slice %8 {offsets = [2, 0], sizes = [1, 128], strides = [1, 1]} : vector<3x128xf32> to vector<1x128xf32>
    %13 = arith.addf %11, %12 : vector<1x128xf32>
    %14 = math.sqrt %13 : vector<1x128xf32>
    %cst_5 = arith.constant 5.000000e-01 : f32
    %15 = vector.broadcast %cst_5 : f32 to vector<1x128xf32>
    %16 = arith.mulf %15, %14 : vector<1x128xf32>
    %cst_6 = arith.constant 0.000000e+00 : f32
    %17 = vector.broadcast %cst_6 : f32 to vector<1x128xf32>
    %18 = arith.cmpf ogt, %13, %17 : vector<1x128xf32>
    %cst_7 = arith.constant 1.000000e+00 : f32
    %19 = vector.broadcast %cst_7 : f32 to vector<1x128xf32>
    %20 = arith.select %18, %14, %19 : vector<1x128xi1>, vector<1x128xf32>
    %21 = math.sin %16 : vector<1x128xf32>
    %22 = arith.divf %21, %20 : vector<1x128xf32>
    %cst_8 = arith.constant 5.000000e-01 : f32
    %23 = vector.broadcast %cst_8 : f32 to vector<1x128xf32>
    %24 = arith.select %18, %22, %23 : vector<1x128xi1>, vector<1x128xf32>
    %25 = math.cos %16 : vector<1x128xf32>
    %cst_9 = arith.constant 1.000000e+00 : f32
    %26 = vector.broadcast %cst_9 : f32 to vector<1x128xf32>
    %27 = arith.select %18, %25, %26 : vector<1x128xi1>, vector<1x128xf32>
    %28 = vector.broadcast %24 : vector<1x128xf32> to vector<3x128xf32>
    %29 = arith.mulf %7, %28 : vector<3x128xf32>
    %30 = vector.extract_strided_slice %29 {offsets = [0, 0], sizes = [1, 128], strides = [1, 1]} : vector<3x128xf32> to vector<1x128xf32>
    %31 = vector.extract_strided_slice %29 {offsets = [1, 0], sizes = [1, 128], strides = [1, 1]} : vector<3x128xf32> to vector<1x128xf32>
    %32 = vector.extract_strided_slice %29 {offsets = [2, 0], sizes = [1, 128], strides = [1, 1]} : vector<3x128xf32> to vector<1x128xf32>
    %33 = arith.mulf %27, %27 : vector<1x128xf32>
    %34 = arith.mulf %30, %30 : vector<1x128xf32>
    %35 = arith.addf %33, %34 : vector<1x128xf32>
    %36 = arith.mulf %31, %31 : vector<1x128xf32>
    %37 = arith.addf %35, %36 : vector<1x128xf32>
    %38 = arith.mulf %32, %32 : vector<1x128xf32>
    %39 = arith.addf %37, %38 : vector<1x128xf32>
    %40 = math.rsqrt %39 : vector<1x128xf32>
    %41 = arith.mulf %27, %40 : vector<1x128xf32>
    %42 = arith.mulf %30, %40 : vector<1x128xf32>
    %43 = arith.mulf %31, %40 : vector<1x128xf32>
    %44 = arith.mulf %32, %40 : vector<1x128xf32>
    %45 = arith.mulf %41, %41 : vector<1x128xf32>
    %46 = arith.mulf %42, %42 : vector<1x128xf32>
    %47 = arith.mulf %43, %43 : vector<1x128xf32>
    %48 = arith.mulf %44, %44 : vector<1x128xf32>
    %49 = arith.mulf %41, %42 : vector<1x128xf32>
    %50 = arith.mulf %41, %43 : vector<1x128xf32>
    %51 = arith.mulf %41, %44 : vector<1x128xf32>
    %52 = arith.mulf %42, %43 : vector<1x128xf32>
    %53 = arith.mulf %42, %44 : vector<1x128xf32>
    %54 = arith.mulf %43, %44 : vector<1x128xf32>
    %55 = arith.addf %45, %46 : vector<1x128xf32>
    %56 = arith.subf %55, %47 : vector<1x128xf32>
    %57 = arith.subf %56, %48 : vector<1x128xf32>
    %cst_10 = arith.constant 2.000000e+00 : f32
    %58 = vector.broadcast %cst_10 : f32 to vector<1x128xf32>
    %59 = arith.mulf %58, %52 : vector<1x128xf32>
    %cst_11 = arith.constant 2.000000e+00 : f32
    %60 = vector.broadcast %cst_11 : f32 to vector<1x128xf32>
    %61 = arith.mulf %60, %51 : vector<1x128xf32>
    %62 = arith.subf %59, %61 : vector<1x128xf32>
    %cst_12 = arith.constant 2.000000e+00 : f32
    %63 = vector.broadcast %cst_12 : f32 to vector<1x128xf32>
    %64 = arith.mulf %63, %50 : vector<1x128xf32>
    %cst_13 = arith.constant 2.000000e+00 : f32
    %65 = vector.broadcast %cst_13 : f32 to vector<1x128xf32>
    %66 = arith.mulf %65, %53 : vector<1x128xf32>
    %67 = arith.addf %64, %66 : vector<1x128xf32>
    %cst_14 = arith.constant 2.000000e+00 : f32
    %68 = vector.broadcast %cst_14 : f32 to vector<1x128xf32>
    %69 = arith.mulf %68, %51 : vector<1x128xf32>
    %cst_15 = arith.constant 2.000000e+00 : f32
    %70 = vector.broadcast %cst_15 : f32 to vector<1x128xf32>
    %71 = arith.mulf %70, %52 : vector<1x128xf32>
    %72 = arith.addf %69, %71 : vector<1x128xf32>
    %73 = arith.subf %45, %46 : vector<1x128xf32>
    %74 = arith.addf %73, %47 : vector<1x128xf32>
    %75 = arith.subf %74, %48 : vector<1x128xf32>
    %cst_16 = arith.constant 2.000000e+00 : f32
    %76 = vector.broadcast %cst_16 : f32 to vector<1x128xf32>
    %77 = arith.mulf %76, %54 : vector<1x128xf32>
    %cst_17 = arith.constant 2.000000e+00 : f32
    %78 = vector.broadcast %cst_17 : f32 to vector<1x128xf32>
    %79 = arith.mulf %78, %49 : vector<1x128xf32>
    %80 = arith.subf %77, %79 : vector<1x128xf32>
    %cst_18 = arith.constant 2.000000e+00 : f32
    %81 = vector.broadcast %cst_18 : f32 to vector<1x128xf32>
    %82 = arith.mulf %81, %53 : vector<1x128xf32>
    %cst_19 = arith.constant 2.000000e+00 : f32
    %83 = vector.broadcast %cst_19 : f32 to vector<1x128xf32>
    %84 = arith.mulf %83, %50 : vector<1x128xf32>
    %85 = arith.subf %82, %84 : vector<1x128xf32>
    %cst_20 = arith.constant 2.000000e+00 : f32
    %86 = vector.broadcast %cst_20 : f32 to vector<1x128xf32>
    %87 = arith.mulf %86, %49 : vector<1x128xf32>
    %cst_21 = arith.constant 2.000000e+00 : f32
    %88 = vector.broadcast %cst_21 : f32 to vector<1x128xf32>
    %89 = arith.mulf %88, %54 : vector<1x128xf32>
    %90 = arith.addf %87, %89 : vector<1x128xf32>
    %91 = arith.subf %45, %46 : vector<1x128xf32>
    %92 = arith.subf %91, %47 : vector<1x128xf32>
    %93 = arith.addf %92, %48 : vector<1x128xf32>
    %cst_22 = arith.constant 0.000000e+00 : f32
    %94 = vector.broadcast %cst_22 : f32 to vector<7x128xf32>
    %95 = tpu.concatenate %57, %62, %67, %72, %75, %80, %85, %90, %93, %94 in 0 : vector<1x128xf32>, vector<1x128xf32>, vector<1x128xf32>, vector<1x128xf32>, vector<1x128xf32>, vector<1x128xf32>, vector<1x128xf32>, vector<1x128xf32>, vector<1x128xf32>, vector<7x128xf32> -> vector<16x128xf32>
    %c0_23 = arith.constant 0 : index
    %c0_24 = arith.constant 0 : index
    %96 = vector.load %arg3[%c0_23, %c0_24] : memref<16x128xf32, #tpu.memory_space<vmem>>, vector<16x128xf32>
    tpu.vector_store %arg3[%c0_23, %c0_24], %95 {strides = array<i32>} : memref<16x128xf32, #tpu.memory_space<vmem>>, vector<16x128xf32>,
    return
  }
}

</mosaic_0001>

<bundles_post_ra>
// kernel: _init_pose_matrices.1
= control target key start
LH: loop header
LB: loop body
LE: loop exit
PB: predicated region body
PF: predicated region fallthrough
CT: control target
= control target key end

     0   :  { %8 = vsyncpa [#allocation3], 0  ;;  %s592_s0 = inlined_call_operand.vmem [shape: f32[1,128], index: 0, kind: input, shape index: {}]   ;;  %s593_s1 = inlined_call_operand.hbm [shape: f32[3,128], index: 1, kind: input, shape index: {}, may-alias: {1,2}]   ;;  %s594_s2 = inlined_call_operand.hbm [shape: f32[3,128], index: 2, kind: input, shape index: {}, may-alias: {1,2}]   ;;  %s595_s3 = inlined_call_operand.vmem [shape: f32[16,128], index: 3, kind: output, shape index: {}]  }
   0x1   :  { %9 = vsyncpa [#allocation5], 0  ;;  %s476_s12 = smov [#allocation2]   ;;  %s477_s14 = smov [#allocation4]  }
   0x2   :  { %s18_s13 = sshll.u32 %s476_s12, 4  ;;  %s28_s15 = sshll.u32 %s477_s14, 4  ;;  %s19_s13 = int_to_ptr.vmem [resolvable:$true] %s18_s13  ;;  %s29_s15 = int_to_ptr.vmem [resolvable:$true] %s28_s15 }
   0x3   :  { %s428_s18 = scalar_lea.hbm %s593_s1, 64 }
   0x4   :  { %p429_p0 = scmp.ne.s32.totalorder %s593_s1, %s428_s18  ;;  %p432_p1 = scmp.lt.u32.totalorder %s428_s18, %s593_s1 }
   0x6   :  { %p434_p2 = pnand %p432_p1, %p429_p0 }
   0x8   :  { %437 = shalt.err (!%p434_p2)
}
   0x9   :  { %s438_s23 = scalar_lea.vmem %s19_s13, 64  ;;  %p443_p4 = scmp.lt.s32.totalorder %s19_s13, %s19_s13 }
   0xa   :  { %p439_p3 = scmp.ne.s32.totalorder %s19_s13, %s438_s23  ;;  %p444_p5 = scmp.lt.s32.totalorder %s438_s23, %s438_s23 }
   0xc   :  { %p445_p6 = por %p444_p5, %p443_p4 }
   0xe   :  { %p446_p7 = pnand %p445_p6, %p439_p3 }
  0x10   :  { %449 = shalt.err (!%p446_p7)
}
  0x11   :  { %21 = dma.hbm_to_vmem [thread:$0]  %s593_s1, 64, %s19_s13, [#allocation3]  }
  0x12   :  { %s450_s28 = scalar_lea.hbm %s594_s2, 64 }
  0x13   :  { %p451_p8 = scmp.ne.s32.totalorder %s594_s2, %s450_s28  ;;  %p454_p9 = scmp.lt.u32.totalorder %s450_s28, %s594_s2 }
  0x15   :  { %p456_p10 = pnand %p454_p9, %p451_p8 }
  0x17   :  { %459 = shalt.err (!%p456_p10)
}
  0x18   :  { %s460_s6 = scalar_lea.vmem %s29_s15, 64  ;;  %p465_p12 = scmp.lt.s32.totalorder %s29_s15, %s29_s15 }
  0x19   :  { %p461_p11 = scmp.ne.s32.totalorder %s29_s15, %s460_s6  ;;  %p466_p13 = scmp.lt.s32.totalorder %s460_s6, %s460_s6 }
  0x1b   :  { %p467_p0 = por %p466_p13, %p465_p12 }
  0x1d   :  { %p468_p1 = pnand %p467_p0, %p461_p11 }
  0x1f   :  { %471 = shalt.err (!%p468_p1)
}
  0x20   :  { %31 = dma.hbm_to_vmem [thread:$0]  %s594_s2, 64, %s29_s15, [#allocation5]  }
  0x21   :  { %472 = dma.done.wait [#allocation3], 64  }
  0x22   :  { %473 = vsyncadd [#allocation3], 4294967232 }
  0x23   :  { %474 = dma.done.wait [#allocation5], 64  }
  0x24   :  { %475 = vsyncadd [#allocation5], 4294967232  ;;  %v43_v0 = vlaneseq  ;;  %v38_v3 = vld [vmem:[%s592_s0] sm:$0x1]  ;;  %v478_v4 = vmov 0  }
  0x25   :  { %vm39_vm0 = vcmp.gt.f32.partialorder %v38_v3, 0.5  ;;  %v40_v6 = vld [vmem:[#allocation4] sm:$0x7]  ;;  %v41_v7 = vld [vmem:[#allocation2] sm:$0x7] }
  0x26   :  { %v529_v1 = vshrl.u32 %v43_v0, 7  ;;  %v42_v5 = vsel %vm39_vm0, 1, %v478_v4  ;;  %v479_v33 = vmov 683565275   ;;  %v480_v35 = vmov 2475754826  }
  0x27   :  { %v481_v37 = vmov 2131351028   ;;  %v482_v39 = vmov 2102212464   ;;  %v483_v41 = vmov 920167782  }
  0x28   :  { %v45_v2 = vsub.s32 0, %v529_v1  ;;  %v484_v48 = vmov 1326507024  }
  0x2a   :  { %v46_v8 = vrot.slane %v42_v5, %v45_v2 }
  0x2c   :  { %vm47_vm1 = vcmp.eq.s32.totalorder %v46_v8, 1 }
  0x2d   :  { %v537_v9 = vsel %vm47_vm1, %v40_v6, %v41_v7 }
  0x2e   :  { %v49_v10 = vmul.f32 %v537_v9, %v537_v9 }
  0x30   :  { %v51_v11 = vrot.slane %v49_v10, 1  ;;  %v54_v12 = vrot.slane %v49_v10, 2 }
  0x32   :  { %v53_v13 = vadd.f32 %v51_v11, %v49_v10 }
  0x34   :  { %v541_v14 = vadd.f32 %v54_v12, %v53_v13 }
  0x36   :  { %418 = vrsqrt.f32 %v541_v14  ;;  %vm59_vm2 = vcmp.eq.f32.partialorder %v541_v14, inf  ;;  %v62_v16 = vand.u32 2147483648, %v541_v14  ;;  %vm61_vm3 = vcmp.eq.f32.partialorder %v541_v14, 0.0 }
  0x37   :  { %vm65_vm4 = vcmp.gt.f32.partialorder %v541_v14, 0.0 }
  0x40   :  { %v419_v15 = vpop.eup %418 }
  0x41   :  { %v58_v17 = vmul.f32 %v419_v15, %v541_v14 }
  0x43   :  { %v60_v18 = vsel %vm59_vm2, %v541_v14, %v58_v17 }
  0x44   :  { %v63_v19 = vsel %vm61_vm3, %v62_v16, %v60_v18 }
  0x45   :  { %v550_v20 = vmul.f32 0.5, %v63_v19  ;;  %v554_v21 = vsel %vm65_vm4, %v63_v19, 1.0 }
  0x47   :  { %v70_v22 = vand.u32 2139095040, %v550_v20  ;;  %v67_v24 = vand.u32 2147483647, %v550_v20  ;;  %vm69_vm12 = vcmp.lt.s32.totalorder %v550_v20, 0 }
  0x49   :  { %v71_v23 = vshrl.u32 %v70_v22, 23  ;;  %v74_v27 = vand.u32 8388607, %v67_v24  ;;  %vm68_vm13 = vcmp.le.f32.partialorder %v67_v24, 0.7853982 }
  0x4b   :  { %v397_v25 = vadd.s32 4294967169, %v71_v23  ;;  %v75_v30 = vor.u32 8388608, %v74_v27 }
  0x4d   :  { %v77_v26 = vadd.s32 1, %v397_v25  ;;  %v115_v50 = vshll.u32 %v75_v30, 8 }
  0x4f   :  { %vm78_vm5 = vcmp.gt.s32.totalorder %v77_v26, 0 }
  0x50   :  { %v79_v28 = vsel %vm78_vm5, %v77_v26, 0  ;;  %vm159_vm5 = vweird.f32 %v550_v20 }
  0x51   :  { %v81_v29 = vand.u32 31, %v79_v28  ;;  %v80_v31 = vshrl.u32 %v79_v28, 5 }
  0x53   :  { %v82_v32 = vsub.s32 32, %v81_v29  ;;  %v84_v34 = vshll.u32 %v479_v33, %v81_v29  ;;  %v87_v36 = vshll.u32 %v480_v35, %v81_v29  ;;  %v90_v38 = vshll.u32 %v481_v37, %v81_v29 }
  0x54   :  { %v93_v40 = vshll.u32 %v482_v39, %v81_v29  ;;  %v96_v42 = vshll.u32 %v483_v41, %v81_v29  ;;  %vm99_vm6 = vcmp.lt.s32.totalorder %v80_v31, 1  ;;  %vm102_vm7 = vcmp.lt.s32.totalorder %v80_v31, 4 }
  0x55   :  { %v83_v43 = vshrl.u32 %v479_v33, %v82_v32  ;;  %v85_v44 = vshrl.u32 %v480_v35, %v82_v32  ;;  %v88_v45 = vshrl.u32 %v481_v37, %v82_v32  ;;  %v91_v46 = vshrl.u32 %v482_v39, %v82_v32 }
  0x56   :  { %v94_v47 = vshrl.u32 %v483_v41, %v82_v32  ;;  %v97_v49 = vshrl.u32 %v484_v48, %v82_v32  ;;  %vm100_vm8 = vcmp.lt.s32.totalorder %v80_v31, 2  ;;  %vm101_vm9 = vcmp.lt.s32.totalorder %v80_v31, 3 }
  0x57   :  { %v86_v51 = vor.u32 %v85_v44, %v84_v34  ;;  %v89_v52 = vor.u32 %v88_v45, %v87_v36  ;;  %v92_v53 = vor.u32 %v91_v46, %v90_v38 }
  0x58   :  { %v95_v54 = vor.u32 %v94_v47, %v93_v40  ;;  %v98_v55 = vor.u32 %v97_v49, %v96_v42 }
  0x59   :  { %v103_v56 = vsel %vm99_vm6, %v83_v43, %v86_v51  ;;  %v104_v57 = vsel %vm102_vm7, %v92_v53, 2102212464  ;;  %v107_v58 = vsel %vm99_vm6, %v86_v51, %v89_v52  ;;  %v111_v59 = vsel %vm99_vm6, %v89_v52, %v92_v53 }
  0x5a   :  { %v105_v60 = vsel %vm101_vm9, %v89_v52, %v104_v57  ;;  %v108_v61 = vsel %vm102_vm7, %v95_v54, 920167782  ;;  %v112_v62 = vsel %vm102_vm7, %v98_v55, 1326507024  ;;  %vm376_vm6 = vcmask 1041408  }
  0x5b   :  { %v109_v63 = vsel %vm101_vm9, %v92_v53, %v108_v61  ;;  %v113_v0 = vsel %vm101_vm9, %v95_v54, %v112_v62  ;;  %v106_v3 = vsel %vm100_vm8, %v103_v56, %v105_v60  ;;  %vm378_vm7 = vcmask 1042432  }
  0x5c   :  { %v110_v4 = vsel %vm100_vm8, %v107_v58, %v109_v63  ;;  %v114_v5 = vsel %vm100_vm8, %v111_v59, %v113_v0  ;;  %v122_v11 = vmul.u32 %v115_v50, %v106_v3  ;;  %vm380_vm8 = vcmask 1043456  }
  0x5d   :  { %v560_v6 = vmul.u32.u64.low %v115_v50, %v114_v5  ;;  %v561_v7 = vmul.u32.u64.high %v115_v50, %v114_v5, %v560_v6  ;;  %v563_v8 = vmul.u32.u64.low %v115_v50, %v110_v4  ;;  %v564_v10 = vmul.u32.u64.high %v115_v50, %v110_v4, %v563_v8 }
  0x5e   :  { %vm382_vm9 = vcmask 1044480  }
  0x5f   :  { %vm124_vm10 = vc.u32 %v561_v7, %v563_v8  ;;  %v125_v12 = vadd.s32 1, %v564_v10  ;;  %v123_v27 = vadd.s32 %v563_v8, %v561_v7 }
  0x61   :  { %v126_v13 = vsel %vm124_vm10, %v125_v12, %v564_v10  ;;  %vm384_vm10 = vcmask 1045504  }
  0x62   :  { %v127_v15 = vadd.s32 %v126_v13, %v122_v11 }
  0x64   :  { %v128_v16 = vadd.s32 536870912, %v127_v15 }
  0x66   :  { %v129_v17 = vshrl.u32 %v128_v16, 30 }
  0x68   :  { %v130_v18 = vshll.u32 %v129_v17, 30  ;;  %v153_v39 = vsub.s32 4, %v129_v17 }
  0x6a   :  { %v131_v19 = vsub.s32 %v127_v15, %v130_v18  ;;  %v154_v42 = vsel %vm69_vm12, %v153_v39, %v129_v17 }
  0x6b   :  { %v156_v45 = vsel %vm68_vm13, 0, %v154_v42 }
  0x6c   :  { %v133_v22 = vsub.s32 0, %v131_v19  ;;  %v160_v46 = vadd.s32 3, %v156_v45  ;;  %v267_v48 = vand.u32 3, %v156_v45 }
  0x6e   :  { %v398_v23 = vmin.u32 %v133_v22, %v131_v19  ;;  %v161_v47 = vand.u32 3, %v160_v46  ;;  %vm272_vm15 = vcmp.eq.s32.totalorder %v267_v48, 2  ;;  %vm269_vm1 = vcmp.eq.s32.totalorder %v267_v48, 0 }
  0x6f   :  { %vm268_vm3 = vcmp.lt.s32.totalorder %v267_v48, 2 }
  0x70   :  { %v135_v25 = vclz %v398_v23  ;;  %vm166_vm14 = vcmp.eq.s32.totalorder %v161_v47, 2  ;;  %vm163_vm0 = vcmp.eq.s32.totalorder %v161_v47, 0  ;;  %vm162_vm2 = vcmp.lt.s32.totalorder %v161_v47, 2 }
  0x72   :  { %v399_v26 = vadd.s32 4294967294, %v135_v25 }
  0x74   :  { %vm400_vm11 = vcmp.lt.s32.totalorder %v399_v26, 0 }
  0x75   :  { %v138_v28 = vsel %vm400_vm11, 0, %v399_v26  ;;  %vm386_vm11 = vcmask 1046528  }
  0x76   :  { %v139_v29 = vsub.s32 32, %v138_v28  ;;  %v140_v30 = vshll.u32 %v131_v19, %v138_v28  ;;  %v143_v31 = vsub.s32 4294967266, %v138_v28 }
  0x78   :  { %v141_v32 = vshrl.u32 %v123_v27, %v139_v29  ;;  %v144_v33 = vadd.s32 127, %v143_v31 }
  0x7a   :  { %v142_v34 = vor.u32 %v141_v32, %v140_v30  ;;  %v145_v35 = vshll.u32 %v144_v33, 23 }
  0x7c   :  { %v146_v36 = vor.u32 4788187, %v145_v35  ;;  %v149_v37 = vcvt.s32.f32 %v142_v34 }
  0x7e   :  { %v147_v38 = vand.u32 2147483647, %v146_v36 }
  0x80   :  { %v150_v40 = vmul.f32 %v149_v37, %v147_v38 }
  0x82   :  { %v151_v41 = vxor.u32 2147483648, %v150_v40 }
  0x84   :  { %v152_v43 = vsel %vm69_vm12, %v151_v41, %v150_v40 }
  0x85   :  { %v155_v44 = vsel %vm68_vm13, %v550_v20, %v152_v43 }
  0x86   :  { %420 = vcosq.f32 %v155_v44 }
  0x87   :  { %422 = vsinq.f32 %v155_v44 }
  0x88   :  { %424 = vrcp.f32 %v554_v21 }
  0x90   :  { %v421_v49 = vpop.eup %420 }
  0x91   :  { %v423_v50 = vpop.eup %422  ;;  %v167_v51 = vxor.u32 2147483648, %v421_v49 }
  0x92   :  { %v164_v24 = vxor.u32 2147483648, %v423_v50  ;;  %v425_v54 = vpop.eup %424 }
  0x93   :  { %v168_v52 = vsel %vm166_vm14, %v167_v51, %v423_v50  ;;  %v274_v53 = vsel %vm272_vm15, %v167_v51, %v423_v50 }
  0x94   :  { %v165_v55 = vsel %vm163_vm0, %v421_v49, %v164_v24  ;;  %v271_v56 = vsel %vm269_vm1, %v421_v49, %v164_v24 }
  0x95   :  { %v169_v21 = vsel %vm162_vm2, %v165_v55, %v168_v52  ;;  %v275_v57 = vsel %vm268_vm3, %v271_v56, %v274_v53 }
  0x96   :  { %v170_v58 = vsel %vm159_vm5, nan, %v169_v21  ;;  %v276_v59 = vsel %vm159_vm5, nan, %v275_v57 }
  0x97   :  { %v172_v60 = vmul.f32 %v425_v54, %v170_v58  ;;  %v277_v61 = vsel %vm65_vm4, %v276_v59, 1.0 }
  0x98   :  { %v283_v0 = vmul.f32 %v277_v61, %v277_v61 }
  0x99   :  { %v173_v62 = vsel %vm65_vm4, %v172_v60, 0.5  ;;  %vm374_vm4 = vcmask 1040384  }
  0x9a   :  { %v281_v63 = vrot.slane %v173_v62, %v45_v2 }
  0x9c   :  { %v282_v20 = vmul.f32 %v281_v63, %v537_v9 }
  0x9e   :  { %v284_v3 = vmul.f32 %v282_v20, %v282_v20 }
  0xa0   :  { %v285_v4 = vadd.f32 %v284_v3, %v283_v0  ;;  %v287_v5 = vrot.slane %v284_v3, 1  ;;  %v290_v6 = vrot.slane %v284_v3, 2 }
  0xa2   :  { %v289_v7 = vadd.f32 %v287_v5, %v285_v4 }
  0xa4   :  { %v292_v8 = vadd.f32 %v290_v6, %v289_v7 }
  0xa6   :  { %426 = vrsqrt.f32 %v292_v8 }
  0xb0   :  { %v427_v10 = vpop.eup %426 }
  0xb1   :  { %v294_v11 = vmul.f32 %v427_v10, %v277_v61  ;;  %v295_v12 = vmul.f32 %v427_v10, %v282_v20  ;;  %v297_v13 = vrot.slane %v427_v10, 7  ;;  %v300_v15 = vrot.slane %v427_v10, 6 }
  0xb3   :  { %v299_v14 = vmul.f32 %v297_v13, %v282_v20  ;;  %v302_v16 = vmul.f32 %v300_v15, %v282_v20  ;;  %v303_v17 = vmul.f32 %v294_v11, %v294_v11  ;;  %v304_v1 = vmul.f32 %v295_v12, %v295_v12 }
  0xb4   :  { %v307_v2 = vmul.f32 %v295_v12, %v294_v11 }
  0xb5   :  { %v305_v9 = vmul.f32 %v299_v14, %v299_v14  ;;  %v306_v18 = vmul.f32 %v302_v16, %v302_v16  ;;  %v309_v19 = vrot.slane %v299_v14, 1  ;;  %v313_v22 = vrot.slane %v302_v16, 2 }
  0xb6   :  { %v318_v23 = vrot.slane %v302_v16, 1  ;;  %v321_v25 = vadd.f32 %v304_v1, %v303_v17  ;;  %v337_v26 = vsub.f32 %v303_v17, %v304_v1  ;;  %v341_v27 = vmul.f32 2.0, %v307_v2 }
  0xb7   :  { %v311_v28 = vmul.f32 %v309_v19, %v294_v11  ;;  %v315_v29 = vmul.f32 %v313_v22, %v294_v11  ;;  %v316_v30 = vmul.f32 %v309_v19, %v295_v12  ;;  %v317_v31 = vmul.f32 %v313_v22, %v295_v12 }
  0xb8   :  { %v320_v32 = vmul.f32 %v318_v23, %v299_v14  ;;  %v323_v33 = vrot.slane %v305_v9, 1  ;;  %v327_v34 = vrot.slane %v306_v18, 2  ;;  %v343_v35 = vrot.slane %v341_v27, 7 }
  0xb9   :  { %v330_v36 = vmul.f32 2.0, %v316_v30  ;;  %v331_v37 = vmul.f32 2.0, %v315_v29  ;;  %v333_v38 = vmul.f32 2.0, %v311_v28  ;;  %v334_v39 = vmul.f32 2.0, %v317_v31 }
  0xba   :  { %v325_v40 = vsub.f32 %v321_v25, %v323_v33  ;;  %v338_v41 = vadd.f32 %v337_v26, %v323_v33  ;;  %v340_v42 = vmul.f32 2.0, %v320_v32  ;;  %v351_v43 = vsub.f32 %v337_v26, %v323_v33 }
  0xbb   :  { %v332_v44 = vsub.f32 %v330_v36, %v331_v37  ;;  %v335_v45 = vadd.f32 %v334_v39, %v333_v38  ;;  %v336_v46 = vadd.f32 %v331_v37, %v330_v36  ;;  %v346_v47 = vsub.f32 %v334_v39, %v333_v38 }
  0xbc   :  { %v329_v48 = vsub.f32 %v325_v40, %v327_v34  ;;  %v339_v49 = vsub.f32 %v338_v41, %v327_v34  ;;  %v345_v50 = vsub.f32 %v340_v42, %v343_v35  ;;  %v348_v51 = vrot.slane %v340_v42, 1 }
  0xbd   :  { %v352_v24 = vadd.f32 %v351_v43, %v327_v34  ;;  %v354_v52 = vrot.slane %v332_v44, 7  ;;  %v357_v53 = vrot.slane %v335_v45, 6  ;;  %v360_v54 = vrot.slane %v336_v46, 5 }
  0xbe   :  { %v350_v55 = vadd.f32 %v348_v51, %v341_v27  ;;  %v363_v56 = vrot.slane %v339_v49, 4  ;;  %v366_v21 = vrot.slane %v345_v50, 4  ;;  %v369_v59 = vrot.slane %v346_v47, 2 }
  0xbf   :  { %v375_v57 = vsel %vm374_vm4, %v329_v48, %v354_v52  ;;  %v388_v58 = vsel %vm374_vm4, %v352_v24, 0.0 }
  0xc0   :  { %v377_v60 = vsel %vm376_vm6, %v375_v57, %v357_v53  ;;  %390 = vst [vmem:[%s595_s3 + $0x8] sm:$0xff] %v388_v58  ;;  %v372_v61 = vrot.slane %v350_v55, 1 }
  0xc1   :  { %v379_v62 = vsel %vm378_vm7, %v377_v60, %v360_v54 }
  0xc2   :  { %v381_v63 = vsel %vm380_vm8, %v379_v62, %v363_v56 }
  0xc3   :  { %v383_v20 = vsel %vm382_vm9, %v381_v63, %v366_v21 }
  0xc4   :  { %v385_v0 = vsel %vm384_vm10, %v383_v20, %v369_v59 }
  0xc5   :  { %v387_v3 = vsel %vm386_vm11, %v385_v0, %v372_v61 }
  0xc6   :  { %389 = vst [vmem:[%s595_s3] sm:$0xff] %v387_v3 }
  0xc7   :  { %395 = vsyncpa [#allocation3], 1 }
  0xc8   :  { %396 = vsyncpa [#allocation5], 1 }

</bundles_post_ra>
